<compile_context>
chip_gen: v7x
topology: tpu7x:2x2x1
jax: 0.10.0
libtpu: 0.0.40
codegen_flags: <defaults>
</compile_context>

<pallas_src>
import functools
import math

import jax
import jax.numpy as jnp
from jax.experimental import pallas as pl
from jax.experimental.pallas import tpu as pltpu


def _fc_stack_kernel(*refs, n_layers, activation, mxu_dtype):
    """refs = (x_ref, w0, b0, w1, b1, ..., w_{L-1}, b_{L-1}, o_ref).

    Layout (batch on the lane axis):
      x_ref : [Din,  tm]   f32 batch tile
      w_l   : [dout, din]  PyTorch [out, in] order, already in mxu_dtype
      b_l   : [dout, 1]    f32, broadcasts over the lane/batch axis
      o_ref : [Dout, tm]   lane-dense output tile
    """
    x_ref = refs[0]
    o_ref = refs[-1]
    param_refs = refs[1:-1]

    h = x_ref[...]                         # [Din, tm] f32, stays on-chip between layers
    for l in range(n_layers):              # static unroll over the layer list
        w = param_refs[2 * l][...]         # [dout, din], pre-cast on host
        b = param_refs[2 * l + 1][...]     # [dout, 1]
        # MXU: y = W @ h -> [dout, tm]; batch (tm) is the lane-dense N dimension.
        y = jnp.dot(w, h.astype(mxu_dtype),
                    preferred_element_type=jnp.float32) + b
        if l < n_layers - 1:
            if activation == "tanh":
                h = jnp.tanh(y)
            elif activation == "elu":
                # ELU(alpha=1): expm1 is one EUP op, exact near 0.
                h = jnp.where(y > 0, y, jnp.expm1(y))
            else:
                # PyTorch FCStack: any other activation string -> relu
                h = jnp.maximum(y, 0.0)
        else:
            h = y                          # output layer: no activation
    o_ref[...] = h.astype(o_ref.dtype)     # full-lane vst (no masked narrow stores)


def fc_stack_pallas(x, params, activation, *, block_b=512, mxu_dtype=jnp.bfloat16):
    """Fused forward pass of the whole FC stack in one pallas_call.

    x: [B, Din] f32.
    params: list of (w [dout, din] in mxu_dtype, b [dout, 1] f32).
    """
    B, Din = x.shape
    n_layers = len(params)
    Dout = params[-1][0].shape[0]

    # Batch tile: large enough to amortize the ~0.35 us per-grid-step overhead,
    # but keep >=2 grid steps when feasible so ("parallel",) can be sharded
    # across both TensorCores on v7x.
    tm = min(B, block_b)
    if tm == B and B >= 256:
        tm = max(128, ((B // 2) // 128) * 128)
    num_blocks = pl.cdiv(B, tm)

    # Batch onto the lane (last) axis; layout plumbing stays in the wrapper.
    xt = x.T                               # [Din, B]

    flat_inputs = [xt]
    in_specs = [pl.BlockSpec((Din, tm), lambda i: (0, i))]
    for w, b in params:
        dout, din = w.shape
        flat_inputs += [w, b]
        # Grid-invariant whole-array blocks, single-buffered (block index never
        # changes, so extra buffers only waste VMEM).
        in_specs += [
            pl.BlockSpec((dout, din), lambda i: (0, 0),
                         pipeline_mode=pl.Buffered(1)),
            pl.BlockSpec((dout, 1), lambda i: (0, 0),
                         pipeline_mode=pl.Buffered(1)),
        ]

    # Explicit VMEM budget: resident params + (double-buffered) activation tiles
    # + inter-layer working set, with ~25% headroom.  Default scoped VMEM
    # (16/32 MiB) is far below physical and would throttle bigger tiles.
    widths = [Din] + [w.shape[0] for w, _ in params]
    max_w = max(widths)
    param_bytes = sum(w.size * w.dtype.itemsize + b.size * b.dtype.itemsize
                      for w, b in params)
    act_bytes = 2 * 2 * tm * max_w * 4     # in + out tiles, double-buffered, f32
    live_bytes = 2 * tm * max_w * 4        # inter-layer activation working set
    vmem_limit = int(1.25 * (param_bytes + act_bytes + live_bytes)) + (4 << 20)
    vmem_limit = max(16 << 20, min(vmem_limit, 64 << 20))
    # TODO(synk): if bf16 weights alone exceed ~40-50 MiB (v7x has 64 MiB VMEM),
    # stream layers (memory_space=pl.ANY + pltpu.emit_pipeline) instead of
    # whole-array weight residency.

    kernel = functools.partial(
        _fc_stack_kernel, n_layers=n_layers, activation=activation,
        mxu_dtype=mxu_dtype)

    out_t = pl.pallas_call(
        kernel,
        out_shape=jax.ShapeDtypeStruct((Dout, B), jnp.float32),
        grid=(num_blocks,),
        in_specs=in_specs,
        out_specs=pl.BlockSpec((Dout, tm), lambda i: (0, i)),
        compiler_params=pltpu.CompilerParams(
            # batch tiles are independent: pipeline + megacore-shard the grid
            dimension_semantics=("parallel",),
            vmem_limit_bytes=vmem_limit,
        ),
    )(*flat_inputs)
    return out_t.T                         # back to [B, Dout]


class FCStackPallas:
    """Pallas port of FCStack: hidden Linear+activation layers, final Linear linear."""

    def __init__(self, input_dim, num_units, activation, output_dim, key,
                 block_b=512, mxu_dtype=jnp.bfloat16):
        self._activation = activation
        self._block_b = block_b
        self._mxu_dtype = mxu_dtype
        self.params = []                    # f32 master copy: (w [out, in], b [out, 1])
        dims = [input_dim] + list(num_units) + [output_dim]
        for i in range(len(dims) - 1):
            din, dout = dims[i], dims[i + 1]
            key, kw, kb = jax.random.split(key, 3)
            # PyTorch nn.Linear default init: U(-1/sqrt(fan_in), 1/sqrt(fan_in))
            bound = 1.0 / math.sqrt(din)
            w = jax.random.uniform(kw, (dout, din), jnp.float32, -bound, bound)
            b = jax.random.uniform(kb, (dout, 1), jnp.float32, -bound, bound)
            self.params.append((w, b))
        # Pre-cast weights once on the host; biases stay f32 (bias-add runs on
        # the f32 accumulator inside the kernel).
        self._mxu_params = [(w.astype(mxu_dtype), b) for w, b in self.params]

    def __call__(self, x):
        return fc_stack_pallas(x, self._mxu_params, self._activation,
                               block_b=self._block_b, mxu_dtype=self._mxu_dtype)


def _reference(x, params, activation):
    """Pure-JAX reference on the f32 master params (w is [out, in])."""
    for w, b in params[:-1]:
        y = x @ w.T + b.reshape(1, -1)
        if activation == "tanh":
            x = jnp.tanh(y)
        elif activation == "elu":
            x = jnp.where(y > 0, y, jnp.expm1(y))
        else:
            x = jnp.maximum(y, 0.0)
    w, b = params[-1]
    return x @ w.T + b.reshape(1, -1)


if __name__ == "__main__":
    key = jax.random.PRNGKey(0)
    k_in, k_model, k_big = jax.random.split(key, 3)

    # ---- small shapes implied by the module (exact f32 path, tight tolerance) ----
    batch = 2
    input_dim = 16
    num_units = (32, 32)
    output_dim = 8
    activation = "tanh"

    x = jax.random.normal(k_in, (batch, input_dim), jnp.float32)
    model = FCStackPallas(input_dim, num_units, activation, output_dim, k_model,
                          mxu_dtype=jnp.float32)
    out = jax.block_until_ready(model(x))
    ref = _reference(x, model.params, activation)
    assert out.shape == (batch, output_dim), out.shape
    assert jnp.allclose(out, ref, atol=1e-5, rtol=1e-5), "f32 fused kernel mismatch"

    # ---- larger batch: tiled 'parallel' grid (>=2 steps) + default bf16 MXU path ----
    big_batch = 512
    xb = jax.random.normal(k_big, (big_batch, input_dim), jnp.float32)
    model_bf16 = FCStackPallas(input_dim, num_units, "elu", output_dim, k_model)
    out_b = jax.block_until_ready(model_bf16(xb))
    ref_b = _reference(xb, model_bf16.params, "elu")
    assert out_b.shape == (big_batch, output_dim), out_b.shape
    assert jnp.allclose(out_b, ref_b, atol=5e-2, rtol=5e-2), "bf16 fused kernel mismatch"

    print("KERNEL_OK")
</pallas_src>

<mosaic_0001>
module attributes {stable_mosaic.version = 11 : i64} {
  func.func @_fc_stack_kernel(%arg0: i32, %arg1: memref<16x2xf32, #tpu.memory_space<vmem>>, %arg2: memref<32x16xf32, #tpu.memory_space<vmem>>, %arg3: memref<32x1xf32, #tpu.memory_space<vmem>>, %arg4: memref<32x32xf32, #tpu.memory_space<vmem>>, %arg5: memref<32x1xf32, #tpu.memory_space<vmem>>, %arg6: memref<8x32xf32, #tpu.memory_space<vmem>>, %arg7: memref<8x1xf32, #tpu.memory_space<vmem>>, %arg8: memref<8x2xf32, #tpu.memory_space<vmem>>) attributes {dimension_semantics = [#tpu.dimension_semantics<parallel>], iteration_bounds = array<i64: 1>, scalar_prefetch = 0 : i64, scratch_operands = 0 : i64, tpu.core_type = #tpu.core_type<tc>, window_params = [{transform_indices = @transform_0, window_bounds = array<i64: 16, 2>}, {pipeline_mode = #tpu.pipeline_mode<synchronous>, transform_indices = @transform_1, window_bounds = array<i64: 32, 16>}, {pipeline_mode = #tpu.pipeline_mode<synchronous>, transform_indices = @transform_2, window_bounds = array<i64: 32, 1>}, {pipeline_mode = #tpu.pipeline_mode<synchronous>, transform_indices = @transform_3, window_bounds = array<i64: 32, 32>}, {pipeline_mode = #tpu.pipeline_mode<synchronous>, transform_indices = @transform_4, window_bounds = array<i64: 32, 1>}, {pipeline_mode = #tpu.pipeline_mode<synchronous>, transform_indices = @transform_5, window_bounds = array<i64: 8, 32>}, {pipeline_mode = #tpu.pipeline_mode<synchronous>, transform_indices = @transform_6, window_bounds = array<i64: 8, 1>}, {transform_indices = @transform_7, window_bounds = array<i64: 8, 2>}]} {
    %c0 = arith.constant 0 : index
    %c0_0 = arith.constant 0 : index
    %0 = vector.load %arg1[%c0, %c0_0] : memref<16x2xf32, #tpu.memory_space<vmem>>, vector<16x2xf32>
    %c0_1 = arith.constant 0 : index
    %c0_2 = arith.constant 0 : index
    %1 = vector.load %arg2[%c0_1, %c0_2] : memref<32x16xf32, #tpu.memory_space<vmem>>, vector<32x16xf32>
    %c0_3 = arith.constant 0 : index
    %c0_4 = arith.constant 0 : index
    %2 = vector.load %arg3[%c0_3, %c0_4] : memref<32x1xf32, #tpu.memory_space<vmem>>, vector<32x1xf32>
    %cst = arith.constant dense<0.000000e+00> : vector<32x2xf32>
    %3 = tpu.matmul %1, %0, %cst {dimension_numbers = #tpu.dot_dimension_numbers<[1], [0], [0], [1], [0, 0, 1, 1], [], []>} : vector<32x16xf32>, vector<16x2xf32>, vector<32x2xf32> -> vector<32x2xf32>
    %4 = vector.broadcast %2 : vector<32x1xf32> to vector<32x2xf32>
    %5 = arith.addf %3, %4 : vector<32x2xf32>
    %6 = math.tanh %5 : vector<32x2xf32>
    %c0_5 = arith.constant 0 : index
    %c0_6 = arith.constant 0 : index
    %7 = vector.load %arg4[%c0_5, %c0_6] : memref<32x32xf32, #tpu.memory_space<vmem>>, vector<32x32xf32>
    %c0_7 = arith.constant 0 : index
    %c0_8 = arith.constant 0 : index
    %8 = vector.load %arg5[%c0_7, %c0_8] : memref<32x1xf32, #tpu.memory_space<vmem>>, vector<32x1xf32>
    %cst_9 = arith.constant dense<0.000000e+00> : vector<32x2xf32>
    %9 = tpu.matmul %7, %6, %cst_9 {dimension_numbers = #tpu.dot_dimension_numbers<[1], [0], [0], [1], [0, 0, 1, 1], [], []>} : vector<32x32xf32>, vector<32x2xf32>, vector<32x2xf32> -> vector<32x2xf32>
    %10 = vector.broadcast %8 : vector<32x1xf32> to vector<32x2xf32>
    %11 = arith.addf %9, %10 : vector<32x2xf32>
    %12 = math.tanh %11 : vector<32x2xf32>
    %c0_10 = arith.constant 0 : index
    %c0_11 = arith.constant 0 : index
    %13 = vector.load %arg6[%c0_10, %c0_11] : memref<8x32xf32, #tpu.memory_space<vmem>>, vector<8x32xf32>
    %c0_12 = arith.constant 0 : index
    %c0_13 = arith.constant 0 : index
    %14 = vector.load %arg7[%c0_12, %c0_13] : memref<8x1xf32, #tpu.memory_space<vmem>>, vector<8x1xf32>
    %cst_14 = arith.constant dense<0.000000e+00> : vector<8x2xf32>
    %15 = tpu.matmul %13, %12, %cst_14 {dimension_numbers = #tpu.dot_dimension_numbers<[1], [0], [0], [1], [0, 0, 1, 1], [], []>} : vector<8x32xf32>, vector<32x2xf32>, vector<8x2xf32> -> vector<8x2xf32>
    %16 = vector.broadcast %14 : vector<8x1xf32> to vector<8x2xf32>
    %17 = arith.addf %15, %16 : vector<8x2xf32>
    %c0_15 = arith.constant 0 : index
    %c0_16 = arith.constant 0 : index
    %18 = vector.load %arg8[%c0_15, %c0_16] : memref<8x2xf32, #tpu.memory_space<vmem>>, vector<8x2xf32>
    tpu.vector_store %arg8[%c0_15, %c0_16], %17 {strides = array<i32>} : memref<8x2xf32, #tpu.memory_space<vmem>>, vector<8x2xf32>,
    return
  }
  func.func @transform_0(%arg0: i32) -> (i32, i32) {
    %c0_i32 = arith.constant 0 : i32
    %c0_i32_0 = arith.constant 0 : i32
    return %c0_i32, %arg0 : i32, i32
  }
  func.func @transform_1(%arg0: i32) -> (i32, i32) {
    %c0_i32 = arith.constant 0 : i32
    %c0_i32_0 = arith.constant 0 : i32
    %c0_i32_1 = arith.constant 0 : i32
    return %c0_i32, %c0_i32_0 : i32, i32
  }
  func.func @transform_2(%arg0: i32) -> (i32, i32) {
    %c0_i32 = arith.constant 0 : i32
    %c0_i32_0 = arith.constant 0 : i32
    %c0_i32_1 = arith.constant 0 : i32
    return %c0_i32, %c0_i32_0 : i32, i32
  }
  func.func @transform_3(%arg0: i32) -> (i32, i32) {
    %c0_i32 = arith.constant 0 : i32
    %c0_i32_0 = arith.constant 0 : i32
    %c0_i32_1 = arith.constant 0 : i32
    return %c0_i32, %c0_i32_0 : i32, i32
  }
  func.func @transform_4(%arg0: i32) -> (i32, i32) {
    %c0_i32 = arith.constant 0 : i32
    %c0_i32_0 = arith.constant 0 : i32
    %c0_i32_1 = arith.constant 0 : i32
    return %c0_i32, %c0_i32_0 : i32, i32
  }
  func.func @transform_5(%arg0: i32) -> (i32, i32) {
    %c0_i32 = arith.constant 0 : i32
    %c0_i32_0 = arith.constant 0 : i32
    %c0_i32_1 = arith.constant 0 : i32
    return %c0_i32, %c0_i32_0 : i32, i32
  }
  func.func @transform_6(%arg0: i32) -> (i32, i32) {
    %c0_i32 = arith.constant 0 : i32
    %c0_i32_0 = arith.constant 0 : i32
    %c0_i32_1 = arith.constant 0 : i32
    return %c0_i32, %c0_i32_0 : i32, i32
  }
  func.func @transform_7(%arg0: i32) -> (i32, i32) {
    %c0_i32 = arith.constant 0 : i32
    %c0_i32_0 = arith.constant 0 : i32
    return %c0_i32, %arg0 : i32, i32
  }
}

</mosaic_0001>

<bundles_post_ra>
// kernel: tpu_custom_call.1
= control target key start
LH: loop header
LB: loop body
LE: loop exit
PB: predicated region body
PF: predicated region fallthrough
CT: control target
= control target key end

     0   :  { %vm56_vm0 = vcmask 130048   ;;  %v477_v3 = vmov 0   ;;  %vm186_vm1 = vcmask 261120   ;;  %v478_v39 = vmov 0.0|0.0   ;;  %s593_s0 = inlined_call_operand.vmem [shape: f32[16,2], index: 0, kind: input, shape index: {}]   ;;  %s594_s1 = inlined_call_operand.vmem [shape: f32[32,16], index: 1, kind: input, shape index: {}]   ;;  %s595_s2 = inlined_call_operand.vmem [shape: f32[32,1], index: 2, kind: input, shape index: {}]   ;;  %s596_s4 = inlined_call_operand.vmem [shape: f32[32,1], index: 4, kind: input, shape index: {}]   ;;  %s597_s6 = inlined_call_operand.vmem [shape: f32[8,1], index: 6, kind: input, shape index: {}]   ;;  %s598_s3 = inlined_call_operand.vmem [shape: f32[32,32], index: 3, kind: input, shape index: {}]   ;;  %s599_s5 = inlined_call_operand.vmem [shape: f32[8,32], index: 5, kind: input, shape index: {}]   ;;  %s600_s7 = inlined_call_operand.vmem [shape: f32[8,2], index: 7, kind: output, shape index: {}]  }
   0x1   :  { %v26_v0 = vld [vmem:[%s593_s0] sm:$0xff]  ;;  %v27_v1 = vld [vmem:[%s593_s0 + $0x8] sm:$0xff]  ;;  %459 = vset.pattern.permute.xlu0 %v477_v3  ;;  %460 = vset.pattern.permute.xlu1 %v477_v3  ;;  %v34_v6 = vld [vmem:[%s595_s2 + $0x10] sm:$0xff]  ;;  %vm479_vm2 = vmmov 0   ;;  %v480_v40 = vmov 0.0   ;;  %vm368_vm3 = vcmask 15360  }
   0x2   :  { %v28_v2 = vld [vmem:[%s594_s1] sm:$0xff]  ;;  %v437_v4 = vpack.c.bf16 %v27_v1, %v26_v0  ;;  %v29_v7 = vld [vmem:[%s594_s1 + $0x8] sm:$0xff]  ;;  %48 = vperm.xlu1 %460, %v34_v6   ;;  %v30_v9 = vld [vmem:[%s594_s1 + $0x10] sm:$0xff] }
   0x3   :  { %406 = vmatprep.mubr.msk.f32.mxu0 %vm56_vm0, %v28_v2  ;;  %v32_v5 = vld [vmem:[%s595_s2] sm:$0xff]  ;;  %v33_v8 = vld [vmem:[%s595_s2 + $0x8] sm:$0xff]  ;;  %v35_v10 = vld [vmem:[%s595_s2 + $0x18] sm:$0xff] }
   0x4   :  { %438 = vmatprep.subr.bf16.mxu0 %v437_v4  ;;  %38 = vperm.xlu0 %459, %v32_v5   ;;  %v31_v11 = vld [vmem:[%s594_s1 + $0x18] sm:$0xff]  ;;  %v162_v12 = vld [vmem:[%s596_s4] sm:$0xff]  ;;  %v163_v13 = vld [vmem:[%s596_s4 + $0x8] sm:$0xff] }
   0x5   :  { %440 = vmatpush3.bf16.msra.mxu0 %v437_v4  ;;  %v164_v14 = vld [vmem:[%s596_s4 + $0x10] sm:$0xff]  ;;  %v165_v15 = vld [vmem:[%s596_s4 + $0x18] sm:$0xff]  ;;  %v289_v16 = vld [vmem:[%s597_s6] sm:$0xff] }
   0x6   :  { %53 = vperm.xlu1 %460, %v35_v10   ;;  %v158_v17 = vld [vmem:[%s598_s3] sm:$0xff]  ;;  %v159_v36 = vld [vmem:[%s598_s3 + $0x8] sm:$0xff]  ;;  %v160_v37 = vld [vmem:[%s598_s3 + $0x10] sm:$0xff]  ;;  %449 = vmatprep.subr.bf16.mxu0 %v478_v39 }
   0x7   :  { %420 = vmatprep.mubr.msk.f32.mxu1 %vm186_vm1, %v158_v17  ;;  %v161_v38 = vld [vmem:[%s598_s3 + $0x18] sm:$0xff]  ;;  %v288_v59 = vld [vmem:[%s599_s5] sm:$0xff] }
   0x8   :  { %407 = vmatmul.mubr.msk.f32.vlgmr.msra.gmra.mrb[0].mxu0 %vm56_vm0, %v29_v7  ;;  %43 = vperm.xlu0 %459, %v33_v8  }
   0x9   :  { %409 = vmatprep.mubr.msk.f32.mxu0 %vm56_vm0, %v30_v9 }
   0xa   :  { %173 = vperm.xlu1 %460, %v163_v13  }
   0xc   :  { %410 = vmatmul.mubr.msk.f32.gmra.mrb[2].mxu0 %vm56_vm0, %v31_v11  ;;  %168 = vperm.xlu0 %459, %v162_v12  }
   0xd   :  { %434 = vmatprep.mubr.msk.f32.mxu0 %vm479_vm2, %v480_v40 }
   0xe   :  { %183 = vperm.xlu1 %460, %v165_v15  }
  0x10   :  { %178 = vperm.xlu0 %459, %v164_v14  }
  0x14   :  { %292 = vperm.xlu0 %459, %v289_v16  }
  0x81   :  { %v49_v19 = vpop.permute.xlu1 %48 }
  0x83   :  { %v39_v18 = vpop.permute.xlu0 %38 }
  0x85   :  { %v54_v25 = vpop.permute.xlu1 %53 }
  0x87   :  { %v44_v20 = vpop.permute.xlu0 %43 }
  0x89   :  { %v174_v41 = vpop.permute.xlu1 %173 }
  0x8b   :  { %v169_v42 = vpop.permute.xlu0 %168 }
  0x8d   :  { %v184_v47 = vpop.permute.xlu1 %183 }
  0x8f   :  { %v179_v49 = vpop.permute.xlu0 %178 }
  0x93   :  { %v293_v60 = vpop.permute.xlu0 %292 }
  0xdb   :  { %v408_v21 = vpop.f32.mrb[0].mxu0 }
  0xdc   :  { %v141_v22 = vadd.f32 %v408_v21, %v44_v20  ;;  %v135_v23 = vpop.f32.mrb[1].mxu0 }
  0xdd   :  { %v136_v24 = vadd.f32 %v135_v23, %v39_v18 }
  0xde   :  { %461 = vtanh.f32 %v141_v22 }
  0xdf   :  { %463 = vtanh.f32 %v136_v24  ;;  %v411_v26 = vpop.f32.mrb[2].mxu0 }
  0xe0   :  { %v151_v27 = vadd.f32 %v411_v26, %v54_v25  ;;  %v145_v28 = vpop.f32.mrb[3].mxu0 }
  0xe1   :  { %v146_v29 = vadd.f32 %v145_v28, %v49_v19 }
  0xe2   :  { %465 = vtanh.f32 %v151_v27 }
  0xe3   :  { %467 = vtanh.f32 %v146_v29 }
  0xe8   :  { %v462_v30 = vpop.eup %461 }
  0xe9   :  { %v464_v31 = vpop.eup %463 }
  0xea   :  { %v441_v32 = vpack.c.bf16 %v462_v30, %v464_v31 }
  0xec   :  { %v466_v33 = vpop.eup %465  ;;  %442 = vmatprep.subr.bf16.mxu1 %v441_v32 }
  0xed   :  { %v468_v34 = vpop.eup %467  ;;  %444 = vmatpush3.bf16.msra.mxu1 %v441_v32 }
  0xee   :  { %v445_v35 = vpack.c.bf16 %v466_v33, %v468_v34 }
  0xf0   :  { %446 = vmatprep.subr.bf16.mxu1 %v445_v35 }
  0xf1   :  { %448 = vmatpush3.bf16.msra.mxu1 %v445_v35 }
  0xf4   :  { %421 = vmatmul.mubr.msk.f32.vlgmr.msra.gmra.mrb[0].mxu1 %vm186_vm1, %v159_v36 }
  0xf5   :  { %423 = vmatprep.mubr.msk.f32.mxu1 %vm186_vm1, %v160_v37 }
  0xf8   :  { %424 = vmatmul.mubr.msk.f32.gmra.mrb[2].mxu1 %vm186_vm1, %v161_v38 }
 0x1c7   :  { %v422_v43 = vpop.f32.mrb[0].mxu1 }
 0x1c8   :  { %v271_v44 = vadd.f32 %v422_v43, %v174_v41  ;;  %v265_v45 = vpop.f32.mrb[1].mxu1 }
 0x1c9   :  { %v266_v46 = vadd.f32 %v265_v45, %v169_v42 }
 0x1ca   :  { %469 = vtanh.f32 %v271_v44 }
 0x1cb   :  { %471 = vtanh.f32 %v266_v46  ;;  %v425_v48 = vpop.f32.mrb[2].mxu1 }
 0x1cc   :  { %v281_v50 = vadd.f32 %v425_v48, %v184_v47  ;;  %v275_v51 = vpop.f32.mrb[3].mxu1 }
 0x1cd   :  { %v276_v52 = vadd.f32 %v275_v51, %v179_v49 }
 0x1ce   :  { %473 = vtanh.f32 %v281_v50 }
 0x1cf   :  { %475 = vtanh.f32 %v276_v52 }
 0x1d4   :  { %v470_v53 = vpop.eup %469 }
 0x1d5   :  { %v472_v54 = vpop.eup %471 }
 0x1d6   :  { %v450_v55 = vpack.c.bf16 %v470_v53, %v472_v54 }
 0x1d8   :  { %v474_v56 = vpop.eup %473  ;;  %451 = vmatpush3.bf16.msra.mxu0 %v450_v55 }
 0x1d9   :  { %v476_v57 = vpop.eup %475  ;;  %452 = vmatprep.subr.bf16.mxu0 %v478_v39 }
 0x1da   :  { %v453_v58 = vpack.c.bf16 %v474_v56, %v476_v57 }
 0x1dc   :  { %454 = vmatpush3.bf16.msra.mxu0 %v453_v58 }
 0x1df   :  { %435 = vmatmul.mubr.msk.f32.vlgmr.msra.gmra.mrb[4].mxu0 %vm186_vm1, %v288_v59 }
 0x2b2   :  { %v364_v61 = vpop.f32.mrb[4].mxu0 }
 0x2b3   :  { %v365_v62 = vadd.f32 %v364_v61, %v293_v60  ;;  %v436_v63 = vpop.f32.mrb[5].mxu0 }
 0x2b5   :  { %369 = vst.msk [vmem:[%s600_s7] sm:$0xff] %vm368_vm3, %v365_v62 }

</bundles_post_ra>
